<compile_context>
chip_gen: v5e
topology: v5e:2x2
jax: 0.10.0
libtpu: 0.0.40
codegen_flags: <defaults>
</compile_context>

<pallas_src>
import functools

import jax
import jax.numpy as jnp
from jax.experimental import pallas as pl
from jax.experimental.pallas import tpu as pltpu


def _round_up(x: int, m: int) -> int:
    return (x + m - 1) // m * m


def _cdiv(a: int, b: int) -> int:
    return -(-a // b)


def _pad2(a, pad_r: int, pad_c: int):
    if pad_r == 0 and pad_c == 0:
        return a
    return jnp.pad(a, ((0, pad_r), (0, pad_c)))


def _is_v5() -> bool:
    try:
        return "v5" in jax.devices()[0].device_kind.lower()
    except Exception:  # pragma: no cover - defensive
        return False


def _vmem_capacity_bytes() -> int:
    try:
        return int(pltpu.get_tpu_info().vmem_capacity_bytes)
    except Exception:  # pragma: no cover - defensive
        return 64 << 20  # conservative: v7x per-TC capacity


# --------------------------------------------------------------------------
# Kernels
# --------------------------------------------------------------------------
def _mlp_resident_kernel(x_ref, w1_ref, b1_ref, w2_ref, b2_ref, o_ref):
    """Weights fully VMEM-resident; grid = (batch tiles,)."""
    h = jnp.dot(x_ref[...], w1_ref[...], preferred_element_type=jnp.float32)
    # Fuse ReLU with the cast so only one (tb, n_hid) copy of h stays live.
    h = jnp.maximum(h + b1_ref[...], 0.0).astype(w2_ref.dtype)
    y = jnp.dot(h, w2_ref[...], preferred_element_type=jnp.float32) + b2_ref[...]
    o_ref[...] = y.astype(o_ref.dtype)


def _mlp_streamed_kernel(x_ref, w1_ref, b1_ref, w2_ref, b2_ref, o_ref, acc_ref):
    """Hidden dim streamed; grid = (batch tiles, hidden tiles)."""
    k = pl.program_id(1)

    @pl.when(k == 0)
    def _():
        acc_ref[...] = jnp.zeros_like(acc_ref)

    h = jnp.dot(x_ref[...], w1_ref[...], preferred_element_type=jnp.float32)
    h = jnp.maximum(h + b1_ref[...], 0.0).astype(w2_ref.dtype)
    acc_ref[...] += jnp.dot(h, w2_ref[...], preferred_element_type=jnp.float32)

    @pl.when(k == pl.num_programs(1) - 1)
    def _():
        o_ref[...] = (acc_ref[...] + b2_ref[...]).astype(o_ref.dtype)


# --------------------------------------------------------------------------
# Wrapper
# --------------------------------------------------------------------------
@functools.partial(jax.jit, static_argnames=("block_b", "block_h", "compute_dtype"))
def mlp_forward(x, w1, b1, w2, b2, *, block_b=512, block_h=None,
                compute_dtype=jnp.bfloat16):
    """x: (B, n_in); w1: (n_in, n_hidden); b1: (1, n_hidden);
    w2: (n_hidden, n_out); b2: (1, n_out) -> (B, n_out).

    compute_dtype: dtype used for x / W1 / W2 in the MXU matmuls (f32 accum).
    block_h: if set, force hidden-dim streaming with that tile size.
    """
    B, n_in = x.shape
    n_hidden = w1.shape[1]
    n_out = w2.shape[1]
    out_dtype = x.dtype

    cds = jnp.dtype(compute_dtype).itemsize
    ods = jnp.dtype(out_dtype).itemsize

    v5 = _is_v5()
    hid_align = 128 if v5 else 256          # v6e/v7x MXU is 2x256x256

    # ---- padded (lane/MXU aligned) feature dims; zeros are inert ----
    n_in_p = _round_up(n_in, 128)
    n_hid_p = _round_up(n_hidden, hid_align)
    n_out_p = _round_up(n_out, 128)         # lane-dense output (no masked vst)

    # ---- batch tile: minimize remainder padding (no full pad to block_b) ----
    n_btiles = max(1, _cdiv(B, max(8, block_b)))
    tb = _round_up(_cdiv(B, n_btiles), 8)   # f32/bf16 sublane packing
    B_p = _round_up(B, tb)

    # ---- VMEM budget per generation (leave headroom for compiler scratch) ----
    budget = int(_vmem_capacity_bytes() * 0.85)

    def resident_bytes(hid):
        return (n_in_p * hid * cds                 # W1 (Buffered(1))
                + hid * n_out_p * cds              # W2 (Buffered(1))
                + (hid + n_out_p) * 4              # biases (f32)
                + 2 * tb * n_in_p * cds            # x tiles (double-buffered)
                + 2 * tb * n_out_p * ods           # out tiles
                + tb * hid * (4 + cds)             # h (f32 + compute-dtype)
                + tb * n_out_p * 4)                # y

    use_streaming = (block_h is not None) or (resident_bytes(n_hid_p) > budget)

    if use_streaming:
        th = block_h if block_h is not None else 512
        th = _round_up(max(th, hid_align), hid_align)
        th = min(th, _round_up(n_hid_p, hid_align))

        def streamed_bytes(th_):
            return (2 * (n_in_p * th_ * cds + th_ * 4 + th_ * n_out_p * cds)
                    + 2 * tb * n_in_p * cds
                    + 2 * tb * n_out_p * ods
                    + tb * n_out_p * 4             # f32 accumulator scratch
                    + n_out_p * 4                  # b2
                    + tb * th_ * (4 + cds))        # h

        if block_h is None:
            while th > hid_align and streamed_bytes(th) > budget:
                th = max(hid_align, th - hid_align)

        n_hid_p = _round_up(n_hid_p, th)

    # ---- pad + cast (skip copies when pad widths are zero) ----
    x_p = _pad2(x, B_p - B, n_in_p - n_in).astype(compute_dtype)
    w1_p = _pad2(w1, n_in_p - n_in, n_hid_p - n_hidden).astype(compute_dtype)
    b1_p = _pad2(b1, 0, n_hid_p - n_hidden).astype(jnp.float32)
    w2_p = _pad2(w2, n_hid_p - n_hidden, n_out_p - n_out).astype(compute_dtype)
    b2_p = _pad2(b2, 0, n_out_p - n_out).astype(jnp.float32)

    flops = 2 * B_p * (n_in_p * n_hid_p + n_hid_p * n_out_p)
    resident = pl.Buffered(1)   # constant-index blocks: no double-buffering

    if not use_streaming:
        grid = (B_p // tb,)
        need = resident_bytes(n_hid_p)
        vmem_limit = min(budget, max(int(need * 3 // 2) + (4 << 20), 32 << 20))
        bytes_accessed = (B_p * n_in_p * cds
                          + n_in_p * n_hid_p * cds + n_hid_p * n_out_p * cds
                          + (n_hid_p + n_out_p) * 4
                          + B_p * n_out_p * ods)

        out = pl.pallas_call(
            _mlp_resident_kernel,
            out_shape=jax.ShapeDtypeStruct((B_p, n_out_p), out_dtype),
            grid_spec=pltpu.PrefetchScalarGridSpec(
                num_scalar_prefetch=0,
                grid=grid,
                in_specs=[
                    # x: tiled over batch -> pipelined behind MXU work
                    pl.BlockSpec((tb, n_in_p), lambda i: (i, 0)),
                    # weights / biases: VMEM-resident, single-buffered
                    pl.BlockSpec((n_in_p, n_hid_p), lambda i: (0, 0),
                                 pipeline_mode=resident),
                    pl.BlockSpec((1, n_hid_p), lambda i: (0, 0),
                                 pipeline_mode=resident),
                    pl.BlockSpec((n_hid_p, n_out_p), lambda i: (0, 0),
                                 pipeline_mode=resident),
                    pl.BlockSpec((1, n_out_p), lambda i: (0, 0),
                                 pipeline_mode=resident),
                ],
                out_specs=pl.BlockSpec((tb, n_out_p), lambda i: (i, 0)),
            ),
            compiler_params=pltpu.CompilerParams(
                dimension_semantics=("parallel",),
                vmem_limit_bytes=vmem_limit,
            ),
            cost_estimate=pl.CostEstimate(flops=flops, transcendentals=0,
                                          bytes_accessed=bytes_accessed),
        )(x_p, w1_p, b1_p, w2_p, b2_p)
    else:
        grid = (B_p // tb, n_hid_p // th)
        need = streamed_bytes(th)
        vmem_limit = min(budget, max(int(need * 3 // 2) + (4 << 20), 32 << 20))
        steps_b = B_p // tb
        bytes_accessed = (B_p * n_in_p * cds
                          + steps_b * n_hid_p * (n_in_p + n_out_p) * cds
                          + (n_hid_p + n_out_p) * 4
                          + B_p * n_out_p * ods)

        out = pl.pallas_call(
            _mlp_streamed_kernel,
            out_shape=jax.ShapeDtypeStruct((B_p, n_out_p), out_dtype),
            grid_spec=pltpu.PrefetchScalarGridSpec(
                num_scalar_prefetch=0,
                grid=grid,
                in_specs=[
                    # x: constant over hidden axis -> DMA'd once per batch tile
                    pl.BlockSpec((tb, n_in_p), lambda i, k: (i, 0)),
                    # W1 column-blocks / W2 row-blocks streamed over k
                    pl.BlockSpec((n_in_p, th), lambda i, k: (0, k)),
                    pl.BlockSpec((1, th), lambda i, k: (0, k)),
                    pl.BlockSpec((th, n_out_p), lambda i, k: (k, 0)),
                    pl.BlockSpec((1, n_out_p), lambda i, k: (0, 0),
                                 pipeline_mode=resident),
                ],
                out_specs=pl.BlockSpec((tb, n_out_p), lambda i, k: (i, 0)),
                scratch_shapes=[pltpu.VMEM((tb, n_out_p), jnp.float32)],
            ),
            compiler_params=pltpu.CompilerParams(
                dimension_semantics=("parallel", "arbitrary"),
                vmem_limit_bytes=vmem_limit,
            ),
            cost_estimate=pl.CostEstimate(flops=flops, transcendentals=0,
                                          bytes_accessed=bytes_accessed),
        )(x_p, w1_p, b1_p, w2_p, b2_p)

    return out[:B, :n_out]


def init_params(key, n_in, n_hidden, n_out, dtype=jnp.float32):
    """Deterministic init mimicking torch.nn.Linear (U(-1/sqrt(fan_in), ...))."""
    k1, k2, k3, k4 = jax.random.split(key, 4)
    bound1 = 1.0 / jnp.sqrt(jnp.array(n_in, dtype))
    bound2 = 1.0 / jnp.sqrt(jnp.array(n_hidden, dtype))
    # Stored already transposed: [in, out]
    w1 = jax.random.uniform(k1, (n_in, n_hidden), dtype, -bound1, bound1)
    b1 = jax.random.uniform(k2, (1, n_hidden), dtype, -bound1, bound1)
    w2 = jax.random.uniform(k3, (n_hidden, n_out), dtype, -bound2, bound2)
    b2 = jax.random.uniform(k4, (1, n_out), dtype, -bound2, bound2)
    return w1, b1, w2, b2


if __name__ == "__main__":
    # Small shapes consistent with the module's forward; batch / hidden chosen
    # so both the batch grid and the hidden-streaming grid get >1 step.
    B, n_in, n_hidden, n_out = 48, 32, 384, 16

    key = jax.random.PRNGKey(0)
    kx, kp = jax.random.split(key)
    x = jax.random.normal(kx, (B, n_in), jnp.float32)
    w1, b1, w2, b2 = init_params(kp, n_in, n_hidden, n_out)

    # Pure-JAX references (same math as the PyTorch forward).
    ref_f32 = jnp.maximum(jnp.dot(x, w1, precision="highest") + b1, 0.0)
    ref_f32 = jnp.dot(ref_f32, w2, precision="highest") + b2

    xb = x.astype(jnp.bfloat16)
    w1b = w1.astype(jnp.bfloat16)
    w2b = w2.astype(jnp.bfloat16)
    hb = jnp.maximum(
        jnp.dot(xb, w1b, preferred_element_type=jnp.float32) + b1, 0.0
    ).astype(jnp.bfloat16)
    ref_bf16 = jnp.dot(hb, w2b, preferred_element_type=jnp.float32) + b2

    # 1) default bf16, weight-resident, batch-tiled path (grid=(3,))
    out_bf16 = jax.block_until_ready(mlp_forward(x, w1, b1, w2, b2, block_b=16))
    # 2) exact f32 path (matches PyTorch numerics)
    out_f32 = jax.block_until_ready(
        mlp_forward(x, w1, b1, w2, b2, block_b=16, compute_dtype=jnp.float32))
    # 3) hidden-dim streamed path (accumulator + pl.when), forced via block_h
    out_str = jax.block_until_ready(
        mlp_forward(x, w1, b1, w2, b2, block_b=16, block_h=128))

    assert out_bf16.shape == (B, n_out)
    assert out_f32.shape == (B, n_out)
    assert out_str.shape == (B, n_out)

    assert jnp.allclose(out_f32, ref_f32, atol=1e-4, rtol=1e-4)
    assert jnp.allclose(out_bf16, ref_bf16, atol=1e-2, rtol=1e-2)
    assert jnp.allclose(out_bf16, ref_f32, atol=1e-1, rtol=1e-1)
    assert jnp.allclose(out_str, ref_bf16, atol=1e-2, rtol=1e-2)

    print("KERNEL_OK")
</pallas_src>

<mosaic_0001>
module attributes {stable_mosaic.version = 11 : i64} {
  func.func @_mlp_resident_kernel(%arg0: i32, %arg1: memref<16x128xbf16, #tpu.memory_space<vmem>>, %arg2: memref<128x512xbf16, #tpu.memory_space<vmem>>, %arg3: memref<1x512xf32, #tpu.memory_space<vmem>>, %arg4: memref<512x128xbf16, #tpu.memory_space<vmem>>, %arg5: memref<1x128xf32, #tpu.memory_space<vmem>>, %arg6: memref<16x128xf32, #tpu.memory_space<vmem>>) attributes {dimension_semantics = [#tpu.dimension_semantics<parallel>], iteration_bounds = array<i64: 3>, scalar_prefetch = 0 : i64, scratch_operands = 0 : i64, tpu.core_type = #tpu.core_type<tc>, window_params = [{transform_indices = @transform_0, window_bounds = array<i64: 16, 128>}, {pipeline_mode = #tpu.pipeline_mode<synchronous>, transform_indices = @transform_1, window_bounds = array<i64: 128, 512>}, {pipeline_mode = #tpu.pipeline_mode<synchronous>, transform_indices = @transform_2, window_bounds = array<i64: 1, 512>}, {pipeline_mode = #tpu.pipeline_mode<synchronous>, transform_indices = @transform_3, window_bounds = array<i64: 512, 128>}, {pipeline_mode = #tpu.pipeline_mode<synchronous>, transform_indices = @transform_4, window_bounds = array<i64: 1, 128>}, {transform_indices = @transform_5, window_bounds = array<i64: 16, 128>}]} {
    %c0 = arith.constant 0 : index
    %c0_0 = arith.constant 0 : index
    %0 = vector.load %arg1[%c0, %c0_0] : memref<16x128xbf16, #tpu.memory_space<vmem>>, vector<16x128xbf16>
    %c0_1 = arith.constant 0 : index
    %c0_2 = arith.constant 0 : index
    %1 = vector.load %arg2[%c0_1, %c0_2] : memref<128x512xbf16, #tpu.memory_space<vmem>>, vector<128x512xbf16>
    %cst = arith.constant dense<0.000000e+00> : vector<16x512xf32>
    %2 = tpu.matmul %0, %1, %cst {dimension_numbers = #tpu.dot_dimension_numbers<[1], [0], [0], [1], [0, 0, 1, 1], [], []>} : vector<16x128xbf16>, vector<128x512xbf16>, vector<16x512xf32> -> vector<16x512xf32>
    %c0_3 = arith.constant 0 : index
    %c0_4 = arith.constant 0 : index
    %3 = vector.load %arg3[%c0_3, %c0_4] : memref<1x512xf32, #tpu.memory_space<vmem>>, vector<1x512xf32>
    %4 = vector.broadcast %3 : vector<1x512xf32> to vector<16x512xf32>
    %5 = arith.addf %2, %4 : vector<16x512xf32>
    %cst_5 = arith.constant 0.000000e+00 : f32
    %6 = vector.broadcast %cst_5 : f32 to vector<16x512xf32>
    %7 = arith.maximumf %5, %6 : vector<16x512xf32>
    %8 = arith.truncf %7 : vector<16x512xf32> to vector<16x512xbf16>
    %c0_6 = arith.constant 0 : index
    %c0_7 = arith.constant 0 : index
    %9 = vector.load %arg4[%c0_6, %c0_7] : memref<512x128xbf16, #tpu.memory_space<vmem>>, vector<512x128xbf16>
    %cst_8 = arith.constant dense<0.000000e+00> : vector<16x128xf32>
    %10 = tpu.matmul %8, %9, %cst_8 {dimension_numbers = #tpu.dot_dimension_numbers<[1], [0], [0], [1], [0, 0, 1, 1], [], []>} : vector<16x512xbf16>, vector<512x128xbf16>, vector<16x128xf32> -> vector<16x128xf32>
    %c0_9 = arith.constant 0 : index
    %c0_10 = arith.constant 0 : index
    %11 = vector.load %arg5[%c0_9, %c0_10] : memref<1x128xf32, #tpu.memory_space<vmem>>, vector<1x128xf32>
    %12 = vector.broadcast %11 : vector<1x128xf32> to vector<16x128xf32>
    %13 = arith.addf %10, %12 : vector<16x128xf32>
    %c0_11 = arith.constant 0 : index
    %c0_12 = arith.constant 0 : index
    %14 = vector.load %arg6[%c0_11, %c0_12] : memref<16x128xf32, #tpu.memory_space<vmem>>, vector<16x128xf32>
    tpu.vector_store %arg6[%c0_11, %c0_12], %13 {strides = array<i32>} : memref<16x128xf32, #tpu.memory_space<vmem>>, vector<16x128xf32>,
    return
  }
  func.func @transform_0(%arg0: i32) -> (i32, i32) {
    %c0_i32 = arith.constant 0 : i32
    %c0_i32_0 = arith.constant 0 : i32
    return %arg0, %c0_i32 : i32, i32
  }
  func.func @transform_1(%arg0: i32) -> (i32, i32) {
    %c0_i32 = arith.constant 0 : i32
    %c0_i32_0 = arith.constant 0 : i32
    %c0_i32_1 = arith.constant 0 : i32
    return %c0_i32, %c0_i32_0 : i32, i32
  }
  func.func @transform_2(%arg0: i32) -> (i32, i32) {
    %c0_i32 = arith.constant 0 : i32
    %c0_i32_0 = arith.constant 0 : i32
    %c0_i32_1 = arith.constant 0 : i32
    return %c0_i32, %c0_i32_0 : i32, i32
  }
  func.func @transform_3(%arg0: i32) -> (i32, i32) {
    %c0_i32 = arith.constant 0 : i32
    %c0_i32_0 = arith.constant 0 : i32
    %c0_i32_1 = arith.constant 0 : i32
    return %c0_i32, %c0_i32_0 : i32, i32
  }
  func.func @transform_4(%arg0: i32) -> (i32, i32) {
    %c0_i32 = arith.constant 0 : i32
    %c0_i32_0 = arith.constant 0 : i32
    %c0_i32_1 = arith.constant 0 : i32
    return %c0_i32, %c0_i32_0 : i32, i32
  }
  func.func @transform_5(%arg0: i32) -> (i32, i32) {
    %c0_i32 = arith.constant 0 : i32
    %c0_i32_0 = arith.constant 0 : i32
    return %arg0, %c0_i32 : i32, i32
  }
}

</mosaic_0001>

<bundles_post_ra>
// kernel: mlp_forward.1
= control target key start
LH: loop header
LB: loop body
LE: loop exit
PB: predicated region body
PF: predicated region fallthrough
CT: control target
= control target key end

     0   :  { %s1263_s18 = smov 0   ;;  %s1580_s0 = inlined_call_operand.vmem [shape: bf16[48,128], index: 0, kind: input, shape index: {}]   ;;  %s1581_s1 = inlined_call_operand.vmem [shape: bf16[128,512], index: 1, kind: input, shape index: {}]   ;;  %s1582_s2 = inlined_call_operand.vmem [shape: f32[1,512], index: 2, kind: input, shape index: {}]   ;;  %s1583_s3 = inlined_call_operand.vmem [shape: bf16[512,128], index: 3, kind: input, shape index: {}]   ;;  %s1584_s4 = inlined_call_operand.vmem [shape: f32[1,128], index: 4, kind: input, shape index: {}]   ;;  %s1585_s5 = inlined_call_operand.vmem [shape: f32[48,128], index: 5, kind: output, shape index: {}]  }
   0x1 LB: > { %s880_s19 = sadd.s32 4294967295, %s1231_s18   ;;  %p884_p0 = scmp.ge.s32.totalorder %s1231_s18, 1  ;;  %s1231_s18 = sphi %s1263_s18, %s15_s18  }
   0x2   : > { %p188_p1 = scmp.lt.s32.totalorder %s1231_s18, 4 }
   0x4   : > { %p189_p2 = pnand %p884_p0, %p188_p1 }
   0x5   : > { %s885_s11 = sshll.u32 (!%p189_p2), %s880_s19, 1 }
   0x6   : > { %192 = sbr.rel (%p189_p2) target bundleno = 338 (0x152), region = 40  ;;  %p217_p3 = scmp.lt.s32.totalorder (!%p189_p2), %s885_s11, 5 }
   0xb   : > { %v1007_v0 = vld [vmem:[%s1581_s1 + $0xe0] sm:$0xf]  ;;  %v1182_v1 = vld [vmem:[%s1581_s1 + $0xec] sm:$0xf0]  ;;  %v1180_v2 = vld [vmem:[%s1581_s1 + $0xe4] sm:$0xf] }
   0xc   : > { %v1008_v3 = vor.u32 %v1182_v1, %v1007_v0  ;;  %v1009_v4 = vld [vmem:[%s1581_s1 + $0xf0] sm:$0xf0]  ;;  %v1015_v5 = vld [vmem:[%s1581_s1 + $0xe8] sm:$0xf]  ;;  %v1183_v6 = vld [vmem:[%s1581_s1 + $0xf4] sm:$0xf0] }
   0xd   : > { %v1012_v7 = vor.u32 %v1180_v2, %v1009_v4  ;;  %v1016_v8 = vor.u32 %v1183_v6, %v1015_v5  ;;  %v1181_v9 = vld [vmem:[%s1581_s1 + $0xec] sm:$0xf]  ;;  %v1017_v10 = vld [vmem:[%s1581_s1 + $0xf8] sm:$0xf0]  ;;  %v991_v11 = vld [vmem:[%s1581_s1 + $0xc0] sm:$0xf] }
   0xe   : > { %438 = vmatpush.bf16.msra.mxu0 %v1008_v3  ;;  %v1020_v12 = vor.u32 %v1181_v9, %v1017_v10  ;;  %v1178_v13 = vld [vmem:[%s1581_s1 + $0xcc] sm:$0xf0]  ;;  %v1176_v14 = vld [vmem:[%s1581_s1 + $0xc4] sm:$0xf]  ;;  %v993_v15 = vld [vmem:[%s1581_s1 + $0xd0] sm:$0xf0] }
   0xf   : > { %452 = vmatpush.bf16.msra.mxu1 %v1012_v7  ;;  %466 = vmatpush.bf16.msra.mxu2 %v1016_v8  ;;  %v992_v16 = vor.u32 %v1178_v13, %v991_v11  ;;  %v996_v17 = vor.u32 %v1176_v14, %v993_v15  ;;  %v999_v18 = vld [vmem:[%s1581_s1 + $0xc8] sm:$0xf]  ;;  %v1179_v19 = vld [vmem:[%s1581_s1 + $0xd4] sm:$0xf0]  ;;  %v1177_v20 = vld [vmem:[%s1581_s1 + $0xcc] sm:$0xf] }
  0x10   : > { %480 = vmatpush.bf16.msra.mxu3 %v1020_v12  ;;  %v1000_v21 = vor.u32 %v1179_v19, %v999_v18  ;;  %v1001_v22 = vld [vmem:[%s1581_s1 + $0xd8] sm:$0xf0]  ;;  %v975_v23 = vld [vmem:[%s1581_s1 + $0xa0] sm:$0xf]  ;;  %v1174_v24 = vld [vmem:[%s1581_s1 + $0xac] sm:$0xf0] }
  0x11   : > { %v1004_v25 = vor.u32 %v1177_v20, %v1001_v22  ;;  %v1172_v26 = vld [vmem:[%s1581_s1 + $0xa4] sm:$0xf]  ;;  %v977_v27 = vld [vmem:[%s1581_s1 + $0xb0] sm:$0xf0]  ;;  %v983_v28 = vld [vmem:[%s1581_s1 + $0xa8] sm:$0xf]  ;;  %v976_v29 = vor.u32 %v1174_v24, %v975_v23 }
  0x12   : > { %439 = vmatpush.bf16.msra.mxu0 %v992_v16  ;;  %v1175_v30 = vld [vmem:[%s1581_s1 + $0xb4] sm:$0xf0]  ;;  %v1173_v31 = vld [vmem:[%s1581_s1 + $0xac] sm:$0xf]  ;;  %v985_v32 = vld [vmem:[%s1581_s1 + $0xb8] sm:$0xf0]  ;;  %v980_v33 = vor.u32 %v1172_v26, %v977_v27 }
  0x13   : > { %453 = vmatpush.bf16.msra.mxu1 %v996_v17  ;;  %467 = vmatpush.bf16.msra.mxu2 %v1000_v21  ;;  %v984_v34 = vor.u32 %v1175_v30, %v983_v28  ;;  %v959_v35 = vld [vmem:[%s1581_s1 + $0x80] sm:$0xf]  ;;  %v1170_v36 = vld [vmem:[%s1581_s1 + $0x8c] sm:$0xf0]  ;;  %v1168_v37 = vld [vmem:[%s1581_s1 + $0x84] sm:$0xf]  ;;  %v988_v38 = vor.u32 %v1173_v31, %v985_v32 }
  0x14   : > { %481 = vmatpush.bf16.msra.mxu3 %v1004_v25  ;;  %v961_v39 = vld [vmem:[%s1581_s1 + $0x90] sm:$0xf0]  ;;  %v967_v40 = vld [vmem:[%s1581_s1 + $0x88] sm:$0xf]  ;;  %v1171_v41 = vld [vmem:[%s1581_s1 + $0x94] sm:$0xf0]  ;;  %v960_v44 = vor.u32 %v1170_v36, %v959_v35 }
  0x15   : > { %v1169_v42 = vld [vmem:[%s1581_s1 + $0x8c] sm:$0xf]  ;;  %v969_v43 = vld [vmem:[%s1581_s1 + $0x98] sm:$0xf0]  ;;  %v964_v45 = vor.u32 %v1168_v37, %v961_v39  ;;  %v968_v46 = vor.u32 %v1171_v41, %v967_v40  ;;  %v943_v47 = vld [vmem:[%s1581_s1 + $0x60] sm:$0xf] }
  0x16   : > { %440 = vmatpush.bf16.msra.mxu0 %v976_v29  ;;  %v1166_v48 = vld [vmem:[%s1581_s1 + $0x6c] sm:$0xf0]  ;;  %v1164_v49 = vld [vmem:[%s1581_s1 + $0x64] sm:$0xf]  ;;  %v972_v50 = vor.u32 %v1169_v42, %v969_v43  ;;  %v945_v51 = vld [vmem:[%s1581_s1 + $0x70] sm:$0xf0] }
  0x17   : > { %454 = vmatpush.bf16.msra.mxu1 %v980_v33  ;;  %468 = vmatpush.bf16.msra.mxu2 %v984_v34  ;;  %v951_v52 = vld [vmem:[%s1581_s1 + $0x68] sm:$0xf]  ;;  %v1167_v53 = vld [vmem:[%s1581_s1 + $0x74] sm:$0xf0]  ;;  %v1165_v54 = vld [vmem:[%s1581_s1 + $0x6c] sm:$0xf]  ;;  %v944_v56 = vor.u32 %v1166_v48, %v943_v47  ;;  %v948_v57 = vor.u32 %v1164_v49, %v945_v51 }
  0x18   : > { %482 = vmatpush.bf16.msra.mxu3 %v988_v38  ;;  %v953_v55 = vld [vmem:[%s1581_s1 + $0x78] sm:$0xf0]  ;;  %v952_v58 = vor.u32 %v1167_v53, %v951_v52  ;;  %v927_v59 = vld [vmem:[%s1581_s1 + $0x40] sm:$0xf]  ;;  %v1162_v60 = vld [vmem:[%s1581_s1 + $0x4c] sm:$0xf0] }
  0x19   : > { %v1160_v61 = vld [vmem:[%s1581_s1 + $0x44] sm:$0xf]  ;;  %v956_v62 = vor.u32 %v1165_v54, %v953_v55  ;;  %v929_v63 = vld [vmem:[%s1581_s1 + $0x50] sm:$0xf0]  ;;  %v935_v0 = vld [vmem:[%s1581_s1 + $0x48] sm:$0xf]  ;;  %v928_v4 = vor.u32 %v1162_v60, %v927_v59 }
  0x1a   : > { %441 = vmatpush.bf16.msra.mxu0 %v960_v44  ;;  %v1163_v1 = vld [vmem:[%s1581_s1 + $0x54] sm:$0xf0]  ;;  %v1161_v2 = vld [vmem:[%s1581_s1 + $0x4c] sm:$0xf]  ;;  %v937_v3 = vld [vmem:[%s1581_s1 + $0x58] sm:$0xf0]  ;;  %v932_v6 = vor.u32 %v1160_v61, %v929_v63 }
  0x1b   : > { %455 = vmatpush.bf16.msra.mxu1 %v964_v45  ;;  %469 = vmatpush.bf16.msra.mxu2 %v968_v46  ;;  %v911_v5 = vld [vmem:[%s1581_s1 + $0x20] sm:$0xf]  ;;  %v936_v7 = vor.u32 %v1163_v1, %v935_v0  ;;  %v1158_v8 = vld [vmem:[%s1581_s1 + $0x2c] sm:$0xf0]  ;;  %v1156_v9 = vld [vmem:[%s1581_s1 + $0x24] sm:$0xf]  ;;  %v940_v11 = vor.u32 %v1161_v2, %v937_v3 }
  0x1c   : > { %483 = vmatpush.bf16.msra.mxu3 %v972_v50  ;;  %v913_v10 = vld [vmem:[%s1581_s1 + $0x30] sm:$0xf0]  ;;  %v919_v12 = vld [vmem:[%s1581_s1 + $0x28] sm:$0xf]  ;;  %v1159_v13 = vld [vmem:[%s1581_s1 + $0x34] sm:$0xf0]  ;;  %v912_v16 = vor.u32 %v1158_v8, %v911_v5 }
  0x1d   : > { %v1157_v14 = vld [vmem:[%s1581_s1 + $0x2c] sm:$0xf]  ;;  %v921_v15 = vld [vmem:[%s1581_s1 + $0x38] sm:$0xf0]  ;;  %v895_v17 = vld [vmem:[%s1581_s1] sm:$0xf]  ;;  %v916_v19 = vor.u32 %v1156_v9, %v913_v10  ;;  %v920_v20 = vor.u32 %v1159_v13, %v919_v12 }
  0x1e   : > { %442 = vmatpush.bf16.msra.mxu0 %v944_v56  ;;  %v1154_v18 = vld [vmem:[%s1581_s1 + $0xc] sm:$0xf0]  ;;  %v1152_v21 = vld [vmem:[%s1581_s1 + $0x4] sm:$0xf]  ;;  %v897_v22 = vld [vmem:[%s1581_s1 + $0x10] sm:$0xf0]  ;;  %v924_v23 = vor.u32 %v1157_v14, %v921_v15 }
  0x1f   : > { %456 = vmatpush.bf16.msra.mxu1 %v948_v57  ;;  %470 = vmatpush.bf16.msra.mxu2 %v952_v58  ;;  %s1587_s11 = smov (!%p217_p3, %s885_s11), 5  ;;  %v903_v24 = vld [vmem:[%s1581_s1 + $0x8] sm:$0xf]  ;;  %v1155_v25 = vld [vmem:[%s1581_s1 + $0x14] sm:$0xf0]  ;;  %v896_v28 = vor.u32 %v1154_v18, %v895_v17  ;;  %v900_v29 = vor.u32 %v1152_v21, %v897_v22  ;;  %v1190_v36 = vld [vmem:[%s1583_s3 + $0x30] sm:$0xff] }
  0x20   : > { %484 = vmatpush.bf16.msra.mxu3 %v956_v62  ;;  %v1153_v26 = vld [vmem:[%s1581_s1 + $0xc] sm:$0xf]  ;;  %v905_v27 = vld [vmem:[%s1581_s1 + $0x18] sm:$0xf0]  ;;  %s886_s8 = sshll.u32 %s1587_s11, 2  ;;  %v904_v30 = vor.u32 %v1155_v25, %v903_v24  ;;  %v1198_v38 = vld [vmem:[%s1583_s3 + $0x70] sm:$0xff] }
  0x21   : > { %s220_s12 = scalar_lea.vmem %s1580_s0, %s886_s8  ;;  %v908_v31 = vor.u32 %v1153_v26, %v905_v27  ;;  %v1191_v32 = vld [vmem:[%s1583_s3 + $0x38] sm:$0xff]  ;;  %v1206_v39 = vld [vmem:[%s1583_s3 + $0xb0] sm:$0xff]  ;;  %v1189_v40 = vld [vmem:[%s1583_s3 + $0x28] sm:$0xff] }
  0x22   : > { %443 = vmatpush.bf16.msra.mxu0 %v928_v4  ;;  %v1151_v33 = vld [vmem:[%s220_s12] sm:$0xff]  ;;  %v1199_v34 = vld [vmem:[%s1583_s3 + $0x78] sm:$0xff]  ;;  %v1214_v41 = vld [vmem:[%s1583_s3 + $0xf0] sm:$0xff]  ;;  %s888_s12 = sshll.u32 %s1587_s11, 3 }
  0x23   : > { %457 = vmatpush.bf16.msra.mxu1 %v932_v6  ;;  %471 = vmatpush.bf16.msra.mxu2 %v936_v7  ;;  %v1207_v35 = vld [vmem:[%s1583_s3 + $0xb8] sm:$0xff]  ;;  %v1197_v42 = vld [vmem:[%s1583_s3 + $0x68] sm:$0xff]  ;;  %v1188_v44 = vld [vmem:[%s1583_s3 + $0x20] sm:$0xff]  ;;  %s226_s15 = scalar_lea.vmem %s1585_s5, %s888_s12 }
  0x24   : > { %485 = vmatpush.bf16.msra.mxu3 %v940_v11  ;;  %v1215_v37 = vld [vmem:[%s1583_s3 + $0xf8] sm:$0xff]  ;;  %v1205_v43 = vld [vmem:[%s1583_s3 + $0xa8] sm:$0xff]  ;;  %v1196_v46 = vld [vmem:[%s1583_s3 + $0x60] sm:$0xff] }
  0x25   : > { %v1213_v45 = vld [vmem:[%s1583_s3 + $0xe8] sm:$0xff]  ;;  %v1187_v47 = vld [vmem:[%s1583_s3 + $0x18] sm:$0xff]  ;;  %v1204_v49 = vld [vmem:[%s1583_s3 + $0xa0] sm:$0xff] }
  0x26   : > { %444 = vmatpush.bf16.msra.mxu0 %v912_v16  ;;  %v1195_v48 = vld [vmem:[%s1583_s3 + $0x58] sm:$0xff]  ;;  %v1212_v50 = vld [vmem:[%s1583_s3 + $0xe0] sm:$0xff]  ;;  %v1186_v51 = vld [vmem:[%s1583_s3 + $0x10] sm:$0xff] }
  0x27   : > { %458 = vmatpush.bf16.msra.mxu1 %v916_v19  ;;  %472 = vmatpush.bf16.msra.mxu2 %v920_v20  ;;  %v1194_v52 = vld [vmem:[%s1583_s3 + $0x50] sm:$0xff]  ;;  %v1203_v53 = vld [vmem:[%s1583_s3 + $0x98] sm:$0xff]  ;;  %v1185_v55 = vld [vmem:[%s1583_s3 + $0x8] sm:$0xff] }
  0x28   : > { %486 = vmatpush.bf16.msra.mxu3 %v924_v23  ;;  %v1211_v54 = vld [vmem:[%s1583_s3 + $0xd8] sm:$0xff]  ;;  %v1193_v56 = vld [vmem:[%s1583_s3 + $0x48] sm:$0xff]  ;;  %v1202_v57 = vld [vmem:[%s1583_s3 + $0x90] sm:$0xff] }
  0x29   : > { %v1210_v58 = vld [vmem:[%s1583_s3 + $0xd0] sm:$0xff]  ;;  %v1184_v59 = vld [vmem:[%s1583_s3] sm:$0xff]  ;;  %v1201_v61 = vld [vmem:[%s1583_s3 + $0x88] sm:$0xff] }
  0x2a   : > { %445 = vmatpush.bf16.msra.mxu0 %v896_v28  ;;  %v1192_v60 = vld [vmem:[%s1583_s3 + $0x40] sm:$0xff]  ;;  %v1209_v62 = vld [vmem:[%s1583_s3 + $0xc8] sm:$0xff] }
  0x2b   : > { %459 = vmatpush.bf16.msra.mxu1 %v900_v29  ;;  %473 = vmatpush.bf16.msra.mxu2 %v904_v30  ;;  %v1200_v63 = vld [vmem:[%s1583_s3 + $0x80] sm:$0xff] }
  0x2c   : > { %487 = vmatpush.bf16.msra.mxu3 %v908_v31  ;;  %v1208_v0 = vld [vmem:[%s1583_s3 + $0xc0] sm:$0xff] }
  0x2d   : > { %446 = vmatmul.bf16.vlgmr.msra.gmra.mxu0 %v1151_v33  ;;  %v262_v1 = vld [vmem:[%s1582_s2] sm:$0xf] }
  0x2e   : > { %766 = vmatpush.bf16.msrb.mxu0 %v1191_v32  ;;  %460 = vmatmul.bf16.vlgmr.msra.gmra.mxu1 %v1151_v33  ;;  %v264_v3 = vperm.slane %v262_v1, 0  ;;  %v265_v5 = vperm.slane %v262_v1, 1  ;;  %v266_v15 = vperm.slane %v262_v1, 2  ;;  %v267_v17 = vperm.slane %v262_v1, 3 }
  0x2f   : > { %780 = vmatpush.bf16.msrb.mxu1 %v1199_v34  ;;  %474 = vmatmul.bf16.vlgmr.msra.gmra.mxu2 %v1151_v33 }
  0x30   : > { %488 = vmatmul.bf16.vlgmr.msra.gmra.mxu3 %v1151_v33  ;;  %794 = vmatpush.bf16.msrb.mxu2 %v1207_v35  ;;  %v1224_v35 = vld [vmem:[%s1584_s4] ss:$0 sm:$0xff] }
  0x31   : > { %808 = vmatpush.bf16.msrb.mxu3 %v1215_v37 }
  0x32   : > { %767 = vmatpush.bf16.msrb.mxu0 %v1190_v36 }
  0x33   : > { %781 = vmatpush.bf16.msrb.mxu1 %v1198_v38 }
  0x34   : > { %795 = vmatpush.bf16.msrb.mxu2 %v1206_v39 }
  0x35   : > { %809 = vmatpush.bf16.msrb.mxu3 %v1214_v41 }
  0x36   : > { %768 = vmatpush.bf16.msrb.mxu0 %v1189_v40 }
  0x37   : > { %782 = vmatpush.bf16.msrb.mxu1 %v1197_v42 }
  0x38   : > { %796 = vmatpush.bf16.msrb.mxu2 %v1205_v43 }
  0x39   : > { %810 = vmatpush.bf16.msrb.mxu3 %v1213_v45 }
  0x3a   : > { %769 = vmatpush.bf16.msrb.mxu0 %v1188_v44 }
  0x3b   : > { %783 = vmatpush.bf16.msrb.mxu1 %v1196_v46 }
  0x3c   : > { %797 = vmatpush.bf16.msrb.mxu2 %v1204_v49 }
  0x3d   : > { %811 = vmatpush.bf16.msrb.mxu3 %v1212_v50 }
  0x3e   : > { %770 = vmatpush.bf16.msrb.mxu0 %v1187_v47 }
  0x3f   : > { %784 = vmatpush.bf16.msrb.mxu1 %v1195_v48 }
  0x40   : > { %798 = vmatpush.bf16.msrb.mxu2 %v1203_v53 }
  0x41   : > { %812 = vmatpush.bf16.msrb.mxu3 %v1211_v54 }
  0x42   : > { %771 = vmatpush.bf16.msrb.mxu0 %v1186_v51 }
  0x43   : > { %785 = vmatpush.bf16.msrb.mxu1 %v1194_v52 }
  0x44   : > { %799 = vmatpush.bf16.msrb.mxu2 %v1202_v57 }
  0x45   : > { %813 = vmatpush.bf16.msrb.mxu3 %v1210_v58 }
  0x46   : > { %772 = vmatpush.bf16.msrb.mxu0 %v1185_v55 }
  0x47   : > { %786 = vmatpush.bf16.msrb.mxu1 %v1193_v56 }
  0x48   : > { %800 = vmatpush.bf16.msrb.mxu2 %v1201_v61 }
  0x49   : > { %814 = vmatpush.bf16.msrb.mxu3 %v1209_v62 }
  0x4a   : > { %773 = vmatpush.bf16.msrb.mxu0 %v1184_v59 }
  0x4b   : > { %787 = vmatpush.bf16.msrb.mxu1 %v1192_v60 }
  0x4c   : > { %801 = vmatpush.bf16.msrb.mxu2 %v1200_v63 }
  0x4d   : > { %815 = vmatpush.bf16.msrb.mxu3 %v1208_v0 }
  0xaa   : > { %v447_v2 = vpop.f32.mrf.mxu0 }
  0xab   : > { %v461_v4 = vpop.f32.mrf.mxu1  ;;  %v448_v6 = vadd.f32 %v447_v2, %v264_v3 }
  0xac   : > { %v462_v7 = vadd.f32 %v461_v4, %v265_v5 }
  0xad   : > { %v494_v11 = vmax.f32 %v448_v6, 0.0 }
  0xae   : > { %v495_v14 = vmax.f32 %v462_v7, 0.0 }
  0xb2   : > { %v475_v8 = vpop.f32.mrf.mxu2  ;;  %v449_v10 = vpop.f32.mrf.mxu0 }
  0xb3   : > { %v489_v9 = vpop.f32.mrf.mxu3  ;;  %v450_v12 = vadd.f32 %v449_v10, %v264_v3  ;;  %v463_v13 = vpop.f32.mrf.mxu1  ;;  %v476_v21 = vadd.f32 %v475_v8, %v266_v15 }
  0xb4   : > { %v464_v16 = vadd.f32 %v463_v13, %v265_v5  ;;  %v490_v23 = vadd.f32 %v489_v9, %v267_v17 }
  0xb5   : > { %v498_v18 = vmax.f32 %v450_v12, 0.0  ;;  %v496_v28 = vmax.f32 %v476_v21, 0.0 }
  0xb6   : > { %v499_v19 = vmax.f32 %v464_v16, 0.0  ;;  %v497_v30 = vmax.f32 %v490_v23, 0.0 }
  0xb7   : > { %v502_v20 = vpack.c.bf16 %v498_v18, %v494_v11 }
  0xb8   : > { %v503_v22 = vpack.c.bf16 %v499_v19, %v495_v14 }
  0xb9   : > { %774 = vmatmul.bf16.vlgmr.msrb.gmra.mxu0 %v502_v20 }
  0xba   : > { %v477_v24 = vpop.f32.mrf.mxu2  ;;  %788 = vmatmul.bf16.vlgmr.msrb.gmra.mxu1 %v503_v22 }
  0xbb   : > { %v478_v25 = vadd.f32 %v477_v24, %v266_v15  ;;  %v491_v26 = vpop.f32.mrf.mxu3 }
  0xbc   : > { %v492_v27 = vadd.f32 %v491_v26, %v267_v17 }
  0xbd   : > { %v500_v29 = vmax.f32 %v478_v25, 0.0 }
  0xbe   : > { %v501_v31 = vmax.f32 %v492_v27, 0.0 }
  0xbf   : > { %v504_v32 = vpack.c.bf16 %v500_v29, %v496_v28 }
  0xc0   : > { %v505_v33 = vpack.c.bf16 %v501_v31, %v497_v30 }
  0xc1   : > { %802 = vmatmul.bf16.vlgmr.msrb.gmra.mxu2 %v504_v32 }
  0xc2   : > { %816 = vmatmul.bf16.vlgmr.msrb.gmra.mxu3 %v505_v33 }
 0x136   : > { %v775_v34 = vpop.f32.mrf.mxu0 }
 0x137   : > { %v776_v36 = vadd.f32 %v1224_v35, %v775_v34  ;;  %v789_v37 = vpop.f32.mrf.mxu1 }
 0x139   : > { %v790_v38 = vadd.f32 %v789_v37, %v776_v36 }
 0x13e   : > { %v777_v39 = vpop.f32.mrf.mxu0 }
 0x13f   : > { %v778_v43 = vadd.f32 %v1224_v35, %v777_v39  ;;  %v791_v45 = vpop.f32.mrf.mxu1 }
 0x141   : > { %v792_v46 = vadd.f32 %v791_v45, %v778_v43 }
 0x144   : > { %v803_v40 = vpop.f32.mrf.mxu2 }
 0x145   : > { %v804_v41 = vadd.f32 %v803_v40, %v790_v38  ;;  %v817_v42 = vpop.f32.mrf.mxu3 }
 0x147   : > { %v818_v44 = vadd.f32 %v817_v42, %v804_v41 }
 0x149   : > { %822 = vst [vmem:[%s226_s15] sm:$0xff] %v818_v44 }
 0x14c   : > { %v805_v47 = vpop.f32.mrf.mxu2 }
 0x14d   : > { %v806_v48 = vadd.f32 %v805_v47, %v792_v46  ;;  %v819_v49 = vpop.f32.mrf.mxu3 }
 0x14f   : > { %v820_v50 = vadd.f32 %v819_v49, %v806_v48 }
 0x151   : > { %823 = vst [vmem:[%s226_s15 + $0x8] sm:$0xff] %v820_v50 }
 0x152 PF: > { %s15_s18 = sadd.s32 1, %s1231_s18  }
 0x153   : > { %p12_p4 = scmp.ge.s32.totalorder %s15_s18, 5  }
 0x155   :  { %14 = sbr.rel (!%p12_p4) target bundleno = 1 (0x1), region = 70 }

</bundles_post_ra>
